<compile_context>
chip_gen: v6e
topology: v6e:2x2x1
jax: 0.10.0
libtpu: 0.0.40
codegen_flags: <defaults>
</compile_context>

<pallas_src>
import functools

import jax
import jax.numpy as jnp
from jax import lax
from jax.experimental import pallas as pl
from jax.experimental.pallas import tpu as pltpu


def _softplus(x):
    # matches torch.nn.functional.softplus(beta=1, threshold=20)
    return jnp.where(x > 20.0, x, jnp.log1p(jnp.exp(jnp.minimum(x, 20.0))))


# ---------------------------------------------------------------------------
# Fused single-pass kernel: grid=(B,), full (C, N_pad) x block resident.
# ---------------------------------------------------------------------------
def _fused_kernel(x_ref, wvk_ref, bvk_ref, wq_ref, bq_ref, gamma_ref, o_ref,
                  kvt_scr, *, c, tn, nt, n_valid, eps, compute_dtype):
    # kvt_scr: (C + 8, D) f32; rows [:C] hold KV^T, row C holds ksum (+eps).
    kvt_scr[...] = jnp.zeros_like(kvt_scr)
    ones_row = jnp.ones((1, tn), compute_dtype)

    # ---- phase 1: accumulate KV^T and ksum over pixel slices -------------
    @pl.loop(0, nt)
    def _(t):
        start = pl.multiple_of(t * tn, tn)
        xb = x_ref[:, pl.ds(start, tn)].astype(compute_dtype)          # (C, TN)
        proj = (jnp.dot(wvk_ref[...], xb, preferred_element_type=jnp.float32)
                + bvk_ref[...])                                         # (C+D, TN) f32
        v = proj[:c]                                                    # (C, TN)
        k = _softplus(proj[c:])                                         # (D, TN)
        if n_valid is not None:  # zero padded pixels so they don't pollute KV/ksum
            col = t * tn + lax.broadcasted_iota(jnp.int32, (1, tn), 1)
            k = jnp.where(col < n_valid, k, 0.0)
        vc = v.astype(compute_dtype)
        kc = k.astype(compute_dtype)
        kvt_scr[pl.ds(0, c), :] += lax.dot_general(
            vc, kc, (((1,), (1,)), ((), ())), preferred_element_type=jnp.float32)
        kvt_scr[pl.ds(c, 1), :] += lax.dot_general(
            ones_row, kc, (((1,), (1,)), ((), ())),
            preferred_element_type=jnp.float32)

    # Fold eps into the denominator row (matches K.sum(-1) + eps before Q dot).
    kvt_scr[pl.ds(c, 1), :] += eps

    kvt_c = kvt_scr[...].astype(compute_dtype)                          # (C+8, D)
    gamma = gamma_ref[0, 0]

    # ---- phase 2: apply attention + residual per pixel slice --------------
    @pl.loop(0, nt)
    def _(t):
        start = pl.multiple_of(t * tn, tn)
        xb = x_ref[:, pl.ds(start, tn)]                                  # (C, TN)
        q = _softplus(
            jnp.dot(wq_ref[...], xb.astype(compute_dtype),
                    preferred_element_type=jnp.float32) + bq_ref[...])   # (D, TN) f32
        # One matmul yields both attn (rows :C) and the denominator (row C).
        full = jnp.dot(kvt_c, q.astype(compute_dtype),
                       preferred_element_type=jnp.float32)               # (C+8, TN)
        attn = full[:c]                                                  # (C, TN)
        denom = full[c:c + 1]                                            # (1, TN)
        scale = gamma / denom                                            # exact divide
        out = xb.astype(jnp.float32) + attn * scale
        o_ref[:, pl.ds(start, tn)] = out.astype(o_ref.dtype)            # lane-dense


# ---------------------------------------------------------------------------
# Two-pass fallback (large C*N): pass 1 accumulates [KV^T ; ksum+eps].
# ---------------------------------------------------------------------------
def _kv_kernel(x_ref, wvk_ref, bvk_ref, kvt_ref, *, c, tn, n_valid, eps,
               compute_dtype):
    t = pl.program_id(1)

    @pl.when(t == 0)
    def _():
        kvt_ref[...] = jnp.zeros_like(kvt_ref)

    xb = x_ref[...].astype(compute_dtype)                                # (C, TN)
    proj = (jnp.dot(wvk_ref[...], xb, preferred_element_type=jnp.float32)
            + bvk_ref[...])                                              # (C+D, TN)
    v = proj[:c]
    k = _softplus(proj[c:])
    if n_valid is not None:
        col = t * tn + lax.broadcasted_iota(jnp.int32, (1, tn), 1)
        k = jnp.where(col < n_valid, k, 0.0)
    vc = v.astype(compute_dtype)
    kc = k.astype(compute_dtype)
    kvt_ref[pl.ds(0, c), :] += lax.dot_general(
        vc, kc, (((1,), (1,)), ((), ())), preferred_element_type=jnp.float32)
    kvt_ref[pl.ds(c, 1), :] += lax.dot_general(
        jnp.ones((1, tn), compute_dtype), kc, (((1,), (1,)), ((), ())),
        preferred_element_type=jnp.float32)

    @pl.when(t == pl.num_programs(1) - 1)
    def _():
        kvt_ref[pl.ds(c, 1), :] += eps


def _apply_kernel(x_ref, wq_ref, bq_ref, kvt_ref, gamma_ref, o_ref, *, c,
                  compute_dtype):
    xb = x_ref[...]                                                      # (C, TN)
    q = _softplus(
        jnp.dot(wq_ref[...], xb.astype(compute_dtype),
                preferred_element_type=jnp.float32) + bq_ref[...])       # (D, TN)
    full = jnp.dot(kvt_ref[...].astype(compute_dtype), q.astype(compute_dtype),
                   preferred_element_type=jnp.float32)                   # (C+8, TN)
    attn = full[:c]
    denom = full[c:c + 1]
    scale = gamma_ref[0, 0] / denom                                      # (1, TN)
    o_ref[...] = (xb.astype(jnp.float32) + attn * scale).astype(o_ref.dtype)


# ---------------------------------------------------------------------------
# Wrapper
# ---------------------------------------------------------------------------
def _pick_tile_n(n_pad, candidates=(1024, 512, 256, 128), min_tiles=2):
    for t in candidates:
        if n_pad % t == 0 and n_pad // t >= min_tiles:
            return t
    for t in candidates:
        if n_pad % t == 0:
            return t
    return n_pad


def _vmem_limit(needed_bytes):
    # headroom, floored at 32 MiB (v5e default is only 16), capped at 64 MiB (v7x).
    return int(min(max(needed_bytes * 5 // 4 + (2 << 20), 32 << 20), 64 << 20))


def pam_forward(x_nchw, wq, bq, wk, bk, wv, bv, gamma, *, eps=1e-6,
                compute_dtype=jnp.bfloat16, force_path=None):
    """x_nchw: (B, C, H, W); wq/wk: (D, C); wv: (C, C); biases (D,)/(C,); gamma scalar."""
    B, C, H, W = x_nchw.shape
    assert C % 8 == 0, "in_places must be a multiple of 8 (sublane alignment)"
    D = wq.shape[0]
    N = H * W
    dtype = x_nchw.dtype
    itemsize = jnp.dtype(dtype).itemsize
    cdt_itemsize = jnp.dtype(compute_dtype).itemsize

    # Pad pixel count to a lane multiple; padded K columns are masked in-kernel.
    n_pad = ((N + 127) // 128) * 128
    x_bcn = x_nchw.reshape(B, C, N)          # free reshape: pixels stay on lanes
    if n_pad != N:
        x_bcn = jnp.pad(x_bcn, ((0, 0), (0, 0), (0, n_pad - N)))
    n_valid = N if n_pad != N else None

    # Fused [V; K] projection weights (V first: both slices sublane-aligned since
    # C % 8 == 0). Weights in compute_dtype (bf16 MXU rate); biases stay f32.
    w_vk = jnp.concatenate([wv, wk], axis=0).astype(compute_dtype)       # (C+D, C)
    b_vk = jnp.concatenate([bv, bk]).reshape(C + D, 1).astype(jnp.float32)
    wq2 = wq.astype(compute_dtype)                                       # (D, C)
    bq2 = bq.reshape(D, 1).astype(jnp.float32)
    gamma2 = jnp.asarray(gamma, jnp.float32).reshape(1, 1)

    xblk_bytes = C * n_pad * itemsize
    w_bytes = (C + 2 * D) * C * cdt_itemsize
    scr_bytes = (C + 8) * max(D, 128) * 4

    use_fused = force_path == "fused" or (
        force_path is None
        and 4 * xblk_bytes + w_bytes + scr_bytes <= (24 << 20))  # v7x-safe budget

    if use_fused:
        # -------- fused single pass: x read from HBM exactly once ----------
        tn = _pick_tile_n(n_pad, candidates=(512, 256, 128), min_tiles=1)
        nt = n_pad // tn
        kern = functools.partial(_fused_kernel, c=C, tn=tn, nt=nt,
                                 n_valid=n_valid, eps=eps,
                                 compute_dtype=compute_dtype)
        needed = 4 * xblk_bytes + w_bytes + scr_bytes + (1 << 20)
        out_bcn = pl.pallas_call(
            kern,
            grid=(B,),
            in_specs=[
                pl.BlockSpec((None, C, n_pad), lambda b: (b, 0, 0)),     # x (resident)
                pl.BlockSpec((C + D, C), lambda b: (0, 0)),              # [Wv; Wk]
                pl.BlockSpec((C + D, 1), lambda b: (0, 0)),              # [bv; bk]
                pl.BlockSpec((D, C), lambda b: (0, 0)),                  # Wq
                pl.BlockSpec((D, 1), lambda b: (0, 0)),                  # bq
                pl.BlockSpec(memory_space=pltpu.MemorySpace.SMEM),       # gamma
            ],
            out_specs=pl.BlockSpec((None, C, n_pad), lambda b: (b, 0, 0)),
            out_shape=jax.ShapeDtypeStruct((B, C, n_pad), dtype),
            scratch_shapes=[pltpu.VMEM((C + 8, D), jnp.float32)],
            compiler_params=pltpu.CompilerParams(
                dimension_semantics=("parallel",),
                vmem_limit_bytes=_vmem_limit(needed)),
        )(x_bcn, w_vk, b_vk, wq2, bq2, gamma2)
    else:
        # -------- two-pass fallback (per-batch block too big for VMEM) -----
        # TODO(synk): on v7x with small B, split the pass-1 NT reduction into 2
        # parallel partials so both TensorCores get work.
        tn = _pick_tile_n(n_pad)
        nt = n_pad // tn

        kv_kern = functools.partial(_kv_kernel, c=C, tn=tn, n_valid=n_valid,
                                    eps=eps, compute_dtype=compute_dtype)
        needed1 = 2 * C * tn * itemsize + 2 * scr_bytes + w_bytes + (1 << 20)
        kvt = pl.pallas_call(
            kv_kern,
            grid=(B, nt),
            in_specs=[
                pl.BlockSpec((None, C, tn), lambda b, t: (b, 0, t)),     # x tile
                pl.BlockSpec((C + D, C), lambda b, t: (0, 0)),           # [Wv; Wk]
                pl.BlockSpec((C + D, 1), lambda b, t: (0, 0)),           # [bv; bk]
            ],
            out_specs=pl.BlockSpec((None, C + 8, D), lambda b, t: (b, 0, 0)),
            out_shape=jax.ShapeDtypeStruct((B, C + 8, D), jnp.float32),
            compiler_params=pltpu.CompilerParams(
                dimension_semantics=("parallel", "arbitrary"),
                vmem_limit_bytes=_vmem_limit(needed1)),
        )(x_bcn, w_vk, b_vk)

        ap_kern = functools.partial(_apply_kernel, c=C,
                                    compute_dtype=compute_dtype)
        needed2 = 4 * C * tn * itemsize + 2 * scr_bytes + w_bytes + (1 << 20)
        out_bcn = pl.pallas_call(
            ap_kern,
            grid=(B, nt),
            in_specs=[
                pl.BlockSpec((None, C, tn), lambda b, t: (b, 0, t)),     # x tile
                pl.BlockSpec((D, C), lambda b, t: (0, 0)),               # Wq
                pl.BlockSpec((D, 1), lambda b, t: (0, 0)),               # bq
                pl.BlockSpec((None, C + 8, D), lambda b, t: (b, 0, 0)),  # [KV^T; ksum]
                pl.BlockSpec(memory_space=pltpu.MemorySpace.SMEM),       # gamma
            ],
            out_specs=pl.BlockSpec((None, C, tn), lambda b, t: (b, 0, t)),
            out_shape=jax.ShapeDtypeStruct((B, C, n_pad), dtype),
            compiler_params=pltpu.CompilerParams(
                dimension_semantics=("parallel", "parallel"),
                vmem_limit_bytes=_vmem_limit(needed2)),
        )(x_bcn, wq2, bq2, kvt, gamma2)

    if n_pad != N:
        out_bcn = out_bcn[:, :, :N]
    return out_bcn.reshape(B, C, H, W)


def pam_reference(x, wq, bq, wk, bk, wv, bv, gamma, eps):
    """Pure-JAX mirror of the PyTorch forward, for verification."""
    B, C, H, W = x.shape
    N = H * W
    xf = x.reshape(B, C, N).astype(jnp.float32)
    Q = jnp.einsum('dc,bcn->bdn', wq, xf) + bq[None, :, None]
    K = jnp.einsum('dc,bcn->bdn', wk, xf) + bk[None, :, None]
    V = jnp.einsum('oc,bcn->bon', wv, xf) + bv[None, :, None]
    Q = jax.nn.softplus(Q).transpose(0, 2, 1)                 # (B, N, D)
    K = jax.nn.softplus(K)                                    # (B, D, N)
    KV = jnp.einsum('bmn,bcn->bmc', K, V)                     # (B, D, C)
    norm = 1.0 / jnp.einsum('bnc,bc->bn', Q, jnp.sum(K, -1) + eps)
    wval = jnp.einsum('bnm,bmc,bn->bcn', Q, KV, norm).reshape(B, C, H, W)
    return x + gamma * wval


if __name__ == "__main__":
    B, C, H, W = 2, 32, 16, 16          # N = 256
    scale = 8
    D = C // scale
    eps = 1e-6

    key = jax.random.PRNGKey(0)
    kx, kq, kk, kv_, kbq, kbk, kbv = jax.random.split(key, 7)

    x = jax.random.normal(kx, (B, C, H, W), jnp.float32)
    wq = jax.random.normal(kq, (D, C), jnp.float32) * 0.1     # 1x1 conv weights (out, in)
    wk = jax.random.normal(kk, (D, C), jnp.float32) * 0.1
    wv = jax.random.normal(kv_, (C, C), jnp.float32) * 0.1
    bq = jax.random.normal(kbq, (D,), jnp.float32) * 0.1
    bk = jax.random.normal(kbk, (D,), jnp.float32) * 0.1
    bv = jax.random.normal(kbv, (C,), jnp.float32) * 0.1
    # nn.__init__ uses gamma = zeros(1) (output == x); use a nonzero value so the
    # attention path is actually exercised.
    gamma = jnp.float32(1.7)

    ref = pam_reference(x, wq, bq, wk, bk, wv, bv, gamma, eps)

    # 1) fused single-pass kernel, f32 compute (exact) -> tight tolerance
    out = jax.block_until_ready(pam_forward(
        x, wq, bq, wk, bk, wv, bv, gamma, eps=eps,
        compute_dtype=jnp.float32, force_path="fused"))
    assert out.shape == ref.shape
    err = float(jnp.max(jnp.abs(out - ref)))
    assert jnp.allclose(out, ref, atol=2e-4, rtol=2e-4), err

    # 2) two-pass fallback kernels, f32 compute -> tight tolerance
    out2 = jax.block_until_ready(pam_forward(
        x, wq, bq, wk, bk, wv, bv, gamma, eps=eps,
        compute_dtype=jnp.float32, force_path="two_pass"))
    err2 = float(jnp.max(jnp.abs(out2 - ref)))
    assert jnp.allclose(out2, ref, atol=2e-4, rtol=2e-4), err2

    # 3) default path: bf16 MXU streaming (production setting) -> looser tolerance
    out3 = jax.block_until_ready(pam_forward(
        x, wq, bq, wk, bk, wv, bv, gamma, eps=eps))
    err3 = float(jnp.max(jnp.abs(out3 - ref)))
    assert jnp.allclose(out3, ref, atol=3e-2, rtol=3e-2), err3

    # 4) ragged pixel count (N not a multiple of 128): exercises pad + K mask
    x4 = jax.random.normal(jax.random.PRNGKey(1), (1, C, 15, 15), jnp.float32)
    ref4 = pam_reference(x4, wq, bq, wk, bk, wv, bv, gamma, eps)
    for path in ("fused", "two_pass"):
        out4 = jax.block_until_ready(pam_forward(
            x4, wq, bq, wk, bk, wv, bv, gamma, eps=eps,
            compute_dtype=jnp.float32, force_path=path))
        err4 = float(jnp.max(jnp.abs(out4 - ref4)))
        assert jnp.allclose(out4, ref4, atol=2e-4, rtol=2e-4), (path, err4)

    print("KERNEL_OK")
</pallas_src>

<mosaic_0001>
module attributes {stable_mosaic.version = 11 : i64} {
  func.func @_fused_kernel(%arg0: i32, %arg1: memref<1x32x256xf32, #tpu.memory_space<vmem>>, %arg2: memref<36x32xf32, #tpu.memory_space<vmem>>, %arg3: memref<36x1xf32, #tpu.memory_space<vmem>>, %arg4: memref<4x32xf32, #tpu.memory_space<vmem>>, %arg5: memref<4x1xf32, #tpu.memory_space<vmem>>, %arg6: memref<1x1xf32, #tpu.memory_space<smem>>, %arg7: memref<1x32x256xf32, #tpu.memory_space<vmem>>, %arg8: memref<40x4xf32, #tpu.memory_space<vmem>>) attributes {dimension_semantics = [#tpu.dimension_semantics<parallel>], iteration_bounds = array<i64: 2>, scalar_prefetch = 0 : i64, scratch_operands = 1 : i64, tpu.core_type = #tpu.core_type<tc>, window_params = [{transform_indices = @transform_0, window_bounds = array<i64: 1, 32, 256>}, {pipeline_mode = #tpu.pipeline_mode<synchronous>, transform_indices = @transform_1, window_bounds = array<i64: 36, 32>}, {pipeline_mode = #tpu.pipeline_mode<synchronous>, transform_indices = @transform_2, window_bounds = array<i64: 36, 1>}, {pipeline_mode = #tpu.pipeline_mode<synchronous>, transform_indices = @transform_3, window_bounds = array<i64: 4, 32>}, {pipeline_mode = #tpu.pipeline_mode<synchronous>, transform_indices = @transform_4, window_bounds = array<i64: 4, 1>}, {transform_indices = @transform_5, window_bounds = array<i64: 1, 1>}, {transform_indices = @transform_6, window_bounds = array<i64: 1, 32, 256>}]} {
    %cst = arith.constant 0.000000e+00 : f32
    %0 = vector.broadcast %cst : f32 to vector<40x4xf32>
    %c0 = arith.constant 0 : index
    %c0_0 = arith.constant 0 : index
    %1 = vector.load %arg8[%c0, %c0_0] : memref<40x4xf32, #tpu.memory_space<vmem>>, vector<40x4xf32>
    tpu.vector_store %arg8[%c0, %c0_0], %0 {strides = array<i32>} : memref<40x4xf32, #tpu.memory_space<vmem>>, vector<40x4xf32>,
    %cst_1 = arith.constant 1.000000e+00 : f32
    %2 = vector.broadcast %cst_1 : f32 to vector<1x256xf32>
    %c0_i32 = arith.constant 0 : i32
    %c1_i32 = arith.constant 1 : i32
    %3 = arith.muli %c0_i32, %c1_i32 : i32
    %c0_i32_2 = arith.constant 0 : i32
    %4 = arith.addi %c0_i32_2, %3 : i32
    %c256_i32 = arith.constant 256 : i32
    %5 = arith.muli %4, %c256_i32 : i32
    %6 = tpu.assume_multiple %5, 256 : i32
    %c0_3 = arith.constant 0 : index
    %c0_4 = arith.constant 0 : index
    %7 = arith.index_cast %6 : i32 to index
    %8 = vector.load %arg1[%c0_3, %c0_4, %7] : memref<1x32x256xf32, #tpu.memory_space<vmem>>, vector<1x32x256xf32>
    %9 = vector.shape_cast %8 : vector<1x32x256xf32> to vector<32x256xf32>
    %c0_5 = arith.constant 0 : index
    %c0_6 = arith.constant 0 : index
    %10 = vector.load %arg2[%c0_5, %c0_6] : memref<36x32xf32, #tpu.memory_space<vmem>>, vector<36x32xf32>
    %cst_7 = arith.constant dense<0.000000e+00> : vector<36x256xf32>
    %11 = tpu.matmul %10, %9, %cst_7 {dimension_numbers = #tpu.dot_dimension_numbers<[1], [0], [0], [1], [0, 0, 1, 1], [], []>} : vector<36x32xf32>, vector<32x256xf32>, vector<36x256xf32> -> vector<36x256xf32>
    %c0_8 = arith.constant 0 : index
    %c0_9 = arith.constant 0 : index
    %12 = vector.load %arg3[%c0_8, %c0_9] : memref<36x1xf32, #tpu.memory_space<vmem>>, vector<36x1xf32>
    %13 = vector.broadcast %12 : vector<36x1xf32> to vector<36x256xf32>
    %14 = arith.addf %11, %13 : vector<36x256xf32>
    %15 = vector.extract_strided_slice %14 {offsets = [0, 0], sizes = [32, 256], strides = [1, 1]} : vector<36x256xf32> to vector<32x256xf32>
    %16 = vector.extract_strided_slice %14 {offsets = [32, 0], sizes = [4, 256], strides = [1, 1]} : vector<36x256xf32> to vector<4x256xf32>
    %cst_10 = arith.constant 2.000000e+01 : f32
    %17 = vector.broadcast %cst_10 : f32 to vector<4x256xf32>
    %18 = arith.cmpf ogt, %16, %17 : vector<4x256xf32>
    %cst_11 = arith.constant 2.000000e+01 : f32
    %19 = vector.broadcast %cst_11 : f32 to vector<4x256xf32>
    %20 = arith.minimumf %16, %19 : vector<4x256xf32>
    %21 = math.exp %20 : vector<4x256xf32>
    %22 = math.log1p %21 : vector<4x256xf32>
    %23 = arith.select %18, %16, %22 : vector<4x256xi1>, vector<4x256xf32>
    %c0_12 = arith.constant 0 : index
    %c0_13 = arith.constant 0 : index
    %24 = vector.load %arg8[%c0_12, %c0_13] : memref<40x4xf32, #tpu.memory_space<vmem>>, vector<32x4xf32>
    %cst_14 = arith.constant dense<0.000000e+00> : vector<32x4xf32>
    %25 = tpu.matmul %15, %23, %cst_14 {dimension_numbers = #tpu.dot_dimension_numbers<[1], [1], [0], [0], [0, 0, 1, 0], [], []>} : vector<32x256xf32>, vector<4x256xf32>, vector<32x4xf32> -> vector<32x4xf32>
    %26 = arith.addf %24, %25 : vector<32x4xf32>
    %c0_15 = arith.constant 0 : index
    %c0_16 = arith.constant 0 : index
    %27 = vector.load %arg8[%c0_15, %c0_16] : memref<40x4xf32, #tpu.memory_space<vmem>>, vector<32x4xf32>
    tpu.vector_store %arg8[%c0_15, %c0_16], %26 {strides = array<i32>} : memref<40x4xf32, #tpu.memory_space<vmem>>, vector<32x4xf32>,
    %c32 = arith.constant 32 : index
    %c0_17 = arith.constant 0 : index
    %28 = vector.load %arg8[%c32, %c0_17] : memref<40x4xf32, #tpu.memory_space<vmem>>, vector<1x4xf32>
    %cst_18 = arith.constant dense<0.000000e+00> : vector<1x4xf32>
    %29 = tpu.matmul %2, %23, %cst_18 {dimension_numbers = #tpu.dot_dimension_numbers<[1], [1], [0], [0], [0, 0, 1, 0], [], []>} : vector<1x256xf32>, vector<4x256xf32>, vector<1x4xf32> -> vector<1x4xf32>
    %30 = arith.addf %28, %29 : vector<1x4xf32>
    %c32_19 = arith.constant 32 : index
    %c0_20 = arith.constant 0 : index
    %31 = vector.load %arg8[%c32_19, %c0_20] : memref<40x4xf32, #tpu.memory_space<vmem>>, vector<1x4xf32>
    tpu.vector_store %arg8[%c32_19, %c0_20], %30 {strides = array<i32>} : memref<40x4xf32, #tpu.memory_space<vmem>>, vector<1x4xf32>,
    %c1_i32_21 = arith.constant 1 : i32
    %c32_22 = arith.constant 32 : index
    %c0_23 = arith.constant 0 : index
    %32 = vector.load %arg8[%c32_22, %c0_23] : memref<40x4xf32, #tpu.memory_space<vmem>>, vector<1x4xf32>
    %cst_24 = arith.constant 9.99999997E-7 : f32
    %33 = vector.broadcast %cst_24 : f32 to vector<1x4xf32>
    %34 = arith.addf %32, %33 : vector<1x4xf32>
    %c32_25 = arith.constant 32 : index
    %c0_26 = arith.constant 0 : index
    %35 = vector.load %arg8[%c32_25, %c0_26] : memref<40x4xf32, #tpu.memory_space<vmem>>, vector<1x4xf32>
    tpu.vector_store %arg8[%c32_25, %c0_26], %34 {strides = array<i32>} : memref<40x4xf32, #tpu.memory_space<vmem>>, vector<1x4xf32>,
    %c0_27 = arith.constant 0 : index
    %c0_28 = arith.constant 0 : index
    %36 = vector.load %arg8[%c0_27, %c0_28] : memref<40x4xf32, #tpu.memory_space<vmem>>, vector<40x4xf32>
    %c0_29 = arith.constant 0 : index
    %c0_30 = arith.constant 0 : index
    %37 = memref.load %arg6[%c0_29, %c0_30] : memref<1x1xf32, #tpu.memory_space<smem>>
    %c0_i32_31 = arith.constant 0 : i32
    %c1_i32_32 = arith.constant 1 : i32
    %38 = arith.muli %c0_i32_31, %c1_i32_32 : i32
    %c0_i32_33 = arith.constant 0 : i32
    %39 = arith.addi %c0_i32_33, %38 : i32
    %c256_i32_34 = arith.constant 256 : i32
    %40 = arith.muli %39, %c256_i32_34 : i32
    %41 = tpu.assume_multiple %40, 256 : i32
    %c0_35 = arith.constant 0 : index
    %c0_36 = arith.constant 0 : index
    %42 = arith.index_cast %41 : i32 to index
    %43 = vector.load %arg1[%c0_35, %c0_36, %42] : memref<1x32x256xf32, #tpu.memory_space<vmem>>, vector<1x32x256xf32>
    %44 = vector.shape_cast %43 : vector<1x32x256xf32> to vector<32x256xf32>
    %c0_37 = arith.constant 0 : index
    %c0_38 = arith.constant 0 : index
    %45 = vector.load %arg4[%c0_37, %c0_38] : memref<4x32xf32, #tpu.memory_space<vmem>>, vector<4x32xf32>
    %cst_39 = arith.constant dense<0.000000e+00> : vector<4x256xf32>
    %46 = tpu.matmul %45, %44, %cst_39 {dimension_numbers = #tpu.dot_dimension_numbers<[1], [0], [0], [1], [0, 0, 1, 1], [], []>} : vector<4x32xf32>, vector<32x256xf32>, vector<4x256xf32> -> vector<4x256xf32>
    %c0_40 = arith.constant 0 : index
    %c0_41 = arith.constant 0 : index
    %47 = vector.load %arg5[%c0_40, %c0_41] : memref<4x1xf32, #tpu.memory_space<vmem>>, vector<4x1xf32>
    %48 = vector.broadcast %47 : vector<4x1xf32> to vector<4x256xf32>
    %49 = arith.addf %46, %48 : vector<4x256xf32>
    %cst_42 = arith.constant 2.000000e+01 : f32
    %50 = vector.broadcast %cst_42 : f32 to vector<4x256xf32>
    %51 = arith.cmpf ogt, %49, %50 : vector<4x256xf32>
    %cst_43 = arith.constant 2.000000e+01 : f32
    %52 = vector.broadcast %cst_43 : f32 to vector<4x256xf32>
    %53 = arith.minimumf %49, %52 : vector<4x256xf32>
    %54 = math.exp %53 : vector<4x256xf32>
    %55 = math.log1p %54 : vector<4x256xf32>
    %56 = arith.select %51, %49, %55 : vector<4x256xi1>, vector<4x256xf32>
    %cst_44 = arith.constant dense<0.000000e+00> : vector<40x256xf32>
    %57 = tpu.matmul %36, %56, %cst_44 {dimension_numbers = #tpu.dot_dimension_numbers<[1], [0], [0], [1], [0, 0, 1, 1], [], []>} : vector<40x4xf32>, vector<4x256xf32>, vector<40x256xf32> -> vector<40x256xf32>
    %58 = vector.extract_strided_slice %57 {offsets = [0, 0], sizes = [32, 256], strides = [1, 1]} : vector<40x256xf32> to vector<32x256xf32>
    %59 = vector.extract_strided_slice %57 {offsets = [32, 0], sizes = [1, 256], strides = [1, 1]} : vector<40x256xf32> to vector<1x256xf32>
    %60 = vector.broadcast %37 : f32 to vector<1x256xf32>
    %61 = arith.divf %60, %59 : vector<1x256xf32>
    %62 = vector.broadcast %61 : vector<1x256xf32> to vector<32x256xf32>
    %63 = arith.mulf %58, %62 : vector<32x256xf32>
    %64 = arith.addf %44, %63 : vector<32x256xf32>
    %c0_45 = arith.constant 0 : index
    %c0_46 = arith.constant 0 : index
    %65 = arith.index_cast %41 : i32 to index
    %66 = vector.load %arg7[%c0_45, %c0_46, %65] : memref<1x32x256xf32, #tpu.memory_space<vmem>>, vector<1x32x256xf32>
    %67 = vector.shape_cast %66 : vector<1x32x256xf32> to vector<32x256xf32>
    %68 = vector.shape_cast %64 : vector<32x256xf32> to vector<1x32x256xf32>
    tpu.vector_store %arg7[%c0_45, %c0_46, %65], %68 {strides = array<i32>} : memref<1x32x256xf32, #tpu.memory_space<vmem>>, vector<1x32x256xf32>,
    %c1_i32_47 = arith.constant 1 : i32
    return
  }
  func.func @transform_0(%arg0: i32) -> (i32, i32, i32) {
    %c0_i32 = arith.constant 0 : i32
    %c0_i32_0 = arith.constant 0 : i32
    %c0_i32_1 = arith.constant 0 : i32
    return %arg0, %c0_i32, %c0_i32_0 : i32, i32, i32
  }
  func.func @transform_1(%arg0: i32) -> (i32, i32) {
    %c0_i32 = arith.constant 0 : i32
    %c0_i32_0 = arith.constant 0 : i32
    %c0_i32_1 = arith.constant 0 : i32
    return %c0_i32, %c0_i32_0 : i32, i32
  }
  func.func @transform_2(%arg0: i32) -> (i32, i32) {
    %c0_i32 = arith.constant 0 : i32
    %c0_i32_0 = arith.constant 0 : i32
    %c0_i32_1 = arith.constant 0 : i32
    return %c0_i32, %c0_i32_0 : i32, i32
  }
  func.func @transform_3(%arg0: i32) -> (i32, i32) {
    %c0_i32 = arith.constant 0 : i32
    %c0_i32_0 = arith.constant 0 : i32
    %c0_i32_1 = arith.constant 0 : i32
    return %c0_i32, %c0_i32_0 : i32, i32
  }
  func.func @transform_4(%arg0: i32) -> (i32, i32) {
    %c0_i32 = arith.constant 0 : i32
    %c0_i32_0 = arith.constant 0 : i32
    %c0_i32_1 = arith.constant 0 : i32
    return %c0_i32, %c0_i32_0 : i32, i32
  }
  func.func @transform_5(%arg0: i32) -> (i32, i32) {
    %c0_i32 = arith.constant 0 : i32
    %c0_i32_0 = arith.constant 0 : i32
    %c0_i32_1 = arith.constant 0 : i32
    return %c0_i32, %c0_i32_0 : i32, i32
  }
  func.func @transform_6(%arg0: i32) -> (i32, i32, i32) {
    %c0_i32 = arith.constant 0 : i32
    %c0_i32_0 = arith.constant 0 : i32
    %c0_i32_1 = arith.constant 0 : i32
    return %arg0, %c0_i32, %c0_i32_0 : i32, i32, i32
  }
}

</mosaic_0001>

<bundles_post_ra>
// kernel: tpu_custom_call.1
= control target key start
LH: loop header
LB: loop body
LE: loop exit
PB: predicated region body
PF: predicated region fallthrough
CT: control target
= control target key end

     0   :  { %s1525_s0 = inlined_call_operand.hbm [shape: f32[2,32,256], index: 0, kind: input, shape index: {}]   ;;  %s1526_s1 = inlined_call_operand.vmem [shape: f32[36,32], index: 1, kind: input, shape index: {}]   ;;  %s1527_s2 = inlined_call_operand.vmem [shape: f32[36,1], index: 2, kind: input, shape index: {}]   ;;  %s1528_s3 = inlined_call_operand.vmem [shape: f32[4,32], index: 3, kind: input, shape index: {}]   ;;  %s1529_s4 = inlined_call_operand.vmem [shape: f32[4,1], index: 4, kind: input, shape index: {}]   ;;  %s1530_s5 = inlined_call_operand.<no memory space> [shape: f32[1,1], index: 5, kind: input, shape index: {}]   ;;  %s1531_s6 = inlined_call_operand.hbm [shape: f32[2,32,256], index: 6, kind: output, shape index: {}]  }
   0x1   :  { %11 = sst [smem:[#allocation3]] %s1530_s5 }
   0x2   :  { %12 = vsyncpa [#allocation5], 0 }
   0x3   :  { %14 = vsyncpa [#allocation5 + $0x1], 0 }
   0x4   :  { %15 = vsyncpa [#allocation6], 0 }
   0x5   :  { %17 = vsyncpa [#allocation6 + $0x1], 0  ;;  %s1242_s23 = smov 0   ;;  %s1244_s24 = smov 0  }
   0x6   :  { %s1246_s25 = smov 0   ;;  %s1248_s26 = smov 0  }
   0x7 LB: > { %s1263_s5 = sadd.s32 4294967295, %s1193_s26   ;;  %s997_s27 = sadd.s32 4294967294, %s1193_s26   ;;  %s1193_s26 = sphi %s1248_s26, %s1546_s26   ;;  %s1189_s25 = sphi %s1246_s25, %s1545_s25   ;;  %s1185_s24 = sphi %s1244_s24, %s1544_s24   ;;  %s1181_s23 = sphi %s1242_s23, %s1543_s23  }
   0x8   : > { %s1267_s28 = sadd.s32 1, %s1193_s26   ;;  %s30_s29 = sadd.s32 1, %s1189_s25 }
   0x9   : > { %s27_s30 = ssub.s32 %s1193_s26, %s1267_s28  ;;  %p37_p0 = scmp.ne.s32.totalorder %s1189_s25, %s1185_s24 }
   0xa   : > { %p28_p1 = scmp.eq.s32.totalorder %s27_s30, 0  ;;  %p38_p2 = scmp.eq.s32.totalorder %s1193_s26, 0 }
   0xb   : > { %p43_p3 = scmp.ne.s32.totalorder %s1185_s24, %s1181_s23  ;;  %p44_p4 = scmp.eq.s32.totalorder %s1263_s5, 0 }
   0xc   : > { %s1279_s7 = scalar_select %p28_p1, %s1189_s25, %s30_s29  }
   0xd   : > { %p1281_p5 = por %p38_p2, %p37_p0  ;;  %p1285_p6 = por %p44_p4, %p43_p3 }
   0xe   : > { %p172_p7 = scmp.eq.s32.totalorder %s1263_s5, 1  ;;  %p178_p8 = scmp.eq.s32.totalorder %s997_s27, 1 }
   0xf   : > { %s1535_s9 = scalar_select %p1285_p6, 1, 0 }
  0x10   : > { %p1038_p10 = scmp.lt.s32.totalorder %s1193_s26, 2  ;;  %p1292_p11 = por %p172_p7, %p37_p0 }
  0x11   : > { %p1296_p12 = por %p178_p8, %p43_p3  ;;  %s213_s12 = sand.u32 1, %s1189_s25  }
  0x12   : > { %s1536_s10 = scalar_select %p1292_p11, 1, 0 }
  0x13   : > { %s1537_s11 = scalar_select %p1296_p12, 1, 0 }
  0x14   : > { %s1024_s13 = sshll.u32 %s1193_s26, 10  ;;  %s1000_s14 = sshll.u32 %s213_s12, 6 }
  0x15   : > { %s1305_s17 = scalar_lea.hbm %s1525_s0, %s1024_s13  ;;  %s217_s18 = scalar_lea.vmem [#allocation4], %s1000_s14 }
  0x16   : > { %s224_s19 = sshll.u32 %s217_s18, 4  ;;  %p1309_p13 = pnand %p1038_p10, %p1281_p5  ;;  %s1313_s19 = int_to_ptr.vmem [resolvable:$true] %s224_s19 }
  0x17   : > { %s1315_s21 = scalar_lea.sflag [#allocation5], %s213_s12  ;;  %s1101_s22 = scalar_lea.hbm %s1305_s17, 1024 }
  0x18   : > { %p1102_p0 = scmp.ne.s32.totalorder %s1305_s17, %s1101_s22  ;;  %p1103_p1 = pneg %p1309_p13 }
  0x19   : > { %s1106_s30 = scalar_lea.hbm %s1525_s0, 2048  ;;  %p1107_p4 = scmp.lt.s32.totalorder %s1305_s17, %s1525_s0 }
  0x1a   : > { %p1104_p2 = pnand %p1103_p1, %p1102_p0  ;;  %p1108_p5 = scmp.lt.s32.totalorder %s1106_s30, %s1101_s22 }
  0x1c   : > { %p1105_p3 = pneg %p1104_p2  ;;  %p1109_p7 = por %p1108_p5, %p1107_p4 }
  0x1e   : > { %p1110_p8 = pnand %p1109_p7, %p1105_p3 }
  0x20   : > { %1113 = shalt.err (!%p1110_p8)
}
  0x21   : > { %s1114_s12 = scalar_lea.vmem %s1313_s19, 1024  ;;  %s1195_s14 = smov [#allocation4]  }
  0x22   : > { %p1115_p10 = scmp.ne.s32.totalorder %s1313_s19, %s1114_s12  ;;  %s1119_s15 = sshll.u32 %s1195_s14, 4  ;;  %s1120_s15 = int_to_ptr.vmem [resolvable:$false] %s1119_s15 }
  0x23   : > { %s1121_s16 = scalar_lea.vmem %s1120_s15, 2048  ;;  %p1122_p2 = scmp.lt.s32.totalorder %s1313_s19, %s1120_s15 }
  0x24   : > { %p1117_p9 = pnand %p1115_p10, %p1103_p1  ;;  %p1123_p12 = scmp.lt.s32.totalorder %s1121_s16, %s1114_s12 }
  0x26   : > { %p1118_p0 = pneg %p1117_p9  ;;  %p1124_p11 = por %p1123_p12, %p1122_p2 }
  0x28   : > { %p1125_p6 = pnand %p1124_p11, %p1118_p0 }
  0x2a   : > { %1128 = shalt.err (!%p1125_p6)
}
  0x2b   : > { %s1196_s18 = smov 256   ;;  %s1197_s22 = smov 16  }
  0x2c   : > { %1033 = dma.hbm_to_vmem [thread:$0]  (!%p1309_p13), %s1305_s17, 1024, %s1313_s19, %s1315_s21, %s1196_s18, %s1196_s18, %s1197_s22  }
  0x2d   : > { %p1003_p9 = scmp.ge.s32.totalorder %s1193_s26, 1  ;;  %p232_p1 = scmp.lt.s32.totalorder %s1193_s26, 3 }
  0x2f   : > { %p233_p3 = pnand %p1003_p9, %p232_p1 }
  0x30   : > { %s1339_s27 = sand.u32 (!%p233_p3), 1, %s1185_s24   ;;  %p1539_p6 = scmp.ne.s32.totalorder (!%p233_p3), %s1535_s9, 0 }
  0x31   : > { %236 = sbr.rel (%p233_p3) target bundleno = 814 (0x32e), region = 44  ;;  %s1004_s29 = sshll.u32 (!%p233_p3), %s1339_s27, 6 }
  0x32   : > { %s239_s30 = scalar_lea.sflag (!%p233_p3), [#allocation5], %s1339_s27  ;;  %s242_s8 = scalar_lea.vmem (!%p233_p3), [#allocation4], %s1004_s29 }
  0x36   : > { %1172 = dma.done.wait (%p1539_p6), %s239_s30, 1024  }
  0x37   : > { %1174 = vsyncadd (%p1539_p6), %s239_s30, 4294966272  ;;  %v1198_v0 = vmov 0.0   ;;  %v1199_v1 = vmov 0   ;;  %v1350_v2 = vld [vmem:[%s242_s8 + $0x38] sm:$0xff]  ;;  %v1352_v3 = vld [vmem:[%s242_s8 + $0x30] sm:$0xff]  ;;  %vm320_vm0 = vcmask 261120  }
  0x38   : > { %400 = vmatprep.mubr.f32.mxu0 %v1198_v0  ;;  %1079 = vset.pattern.permute.xlu0 %v1199_v1  ;;  %v1354_v4 = vld [vmem:[%s242_s8 + $0x28] sm:$0xff]  ;;  %v1357_v5 = vld [vmem:[%s242_s8 + $0x20] sm:$0xff]  ;;  %v1360_v6 = vld [vmem:[%s242_s8 + $0x18] sm:$0xff]  ;;  %v1200_v21 = vmov 1.0   ;;  %vm271_vm1 = vcmask 31744   ;;  %vm628_vm6 = vcmask 24576  }
  0x39   : > { %1080 = vset.pattern.permute.xlu1 %v1199_v1  ;;  %360 = vmatprep.subr.mxu0 %v1350_v2  ;;  %v1363_v7 = vld [vmem:[%s242_s8 + $0x10] sm:$0xff]  ;;  %v1366_v8 = vld [vmem:[%s242_s8 + $0x8] sm:$0xff]  ;;  %v294_v9 = vld [vmem:[%s1527_s2 + $0x20] sm:$0xf]  ;;  %272 = vst.msk [vmem:[#allocation2] sm:$0xff] %vm271_vm1, %v1198_v0  ;;  %vm771_vm9 = vcmask 1043456  }
  0x3a   : > { %361 = vmatpush1.msra.mxu0 %v1352_v3  ;;  %v1372_v10 = vld [vmem:[%s242_s8] sm:$0xff]  ;;  %317 = vperm.xlu0 %1079, %v294_v9   ;;  %v285_v12 = vld [vmem:[%s1526_s1] sm:$0xff]  ;;  %v292_v14 = vld [vmem:[%s1527_s2 + $0x10] sm:$0xff]  ;;  %273 = vst.msk [vmem:[#allocation2 + $0x8] sm:$0xff] %vm271_vm1, %v1198_v0  ;;  %s638_s18 = sld [smem:[#allocation3]]  ;;  %s1025_s22 = sshll.u32 %s1263_s5, 10 }
  0x3b   : > { %362 = vmatprep.subr.mxu0 %v1354_v4  ;;  %v291_v11 = vld [vmem:[%s1527_s2 + $0x8] sm:$0xff]  ;;  %v290_v13 = vld [vmem:[%s1527_s2] sm:$0xff]  ;;  %v293_v16 = vld [vmem:[%s1527_s2 + $0x18] sm:$0xff]  ;;  %274 = vst.msk [vmem:[#allocation2 + $0x10] sm:$0xff] %vm271_vm1, %v1198_v0  ;;  %s270_s30 = scalar_lea.vmem [#allocation7], %s1004_s29  ;;  %s1476_s9 = scalar_lea.hbm %s1531_s6, %s1025_s22 }
  0x3c   : > { %363 = vmatpush1.msra.mxu0 %v1357_v5  ;;  %302 = vperm.xlu1 %1080, %v291_v11   ;;  %v286_v15 = vld [vmem:[%s1526_s1 + $0x8] sm:$0xff]  ;;  %v648_v17 = vld [vmem:[%s1529_s4] sm:$0xf]  ;;  %v287_v18 = vld [vmem:[%s1526_s1 + $0x10] sm:$0xff]  ;;  %275 = vst.msk [vmem:[#allocation2 + $0x18] sm:$0xff] %vm271_vm1, %v1198_v0  ;;  %s924_s8 = sshll.u32 %s270_s30, 4  ;;  %s1478_s8 = int_to_ptr.vmem [resolvable:$true] %s924_s8 }
  0x3d   : > { %364 = vmatprep.subr.mxu0 %v1360_v6  ;;  %v288_v19 = vld [vmem:[%s1526_s1 + $0x18] sm:$0xff]  ;;  %v289_v20 = vld [vmem:[%s1526_s1 + $0x20] sm:$0xf]  ;;  %276 = vst.msk [vmem:[#allocation2 + $0x20] sm:$0xff] %vm271_vm1, %v1198_v0  ;;  %s911_s17 = scalar_lea.sflag [#allocation6], %s1339_s27  ;;  %s1129_s19 = scalar_lea.vmem %s1478_s8, 1024 }
  0x3e   : > { %365 = vmatpush1.msra.mxu0 %v1363_v7  ;;  %297 = vperm.xlu0 %1079, %v290_v13   ;;  %p1130_p11 = scmp.ne.s32.totalorder %s1478_s8, %s1129_s19  ;;  %p1540_p12 = scmp.ne.s32.totalorder %s1536_s10, 0 }
  0x3f   : > { %366 = vmatprep.subr.mxu0 %v1366_v8  ;;  %s1201_s20 = smov [#allocation7]  }
  0x40   : > { %367 = vmatpush1.msra.mxu0 %v1372_v10  ;;  %307 = vperm.xlu1 %1080, %v292_v14   ;;  %p1131_p13 = pnand %p1130_p11, %p1540_p12  ;;  %s1133_s21 = sshll.u32 %s1201_s20, 4  ;;  %s1134_s21 = int_to_ptr.vmem [resolvable:$false] %s1133_s21 }
  0x41   : > { %1006 = vmatmul.mubr.msk.f32.vlgmr.msra.gmra.mxu0 %vm320_vm0, %v285_v12  ;;  %v647_v12 = vld [vmem:[%s1528_s3] sm:$0xf]  ;;  %s1135_s13 = scalar_lea.vmem %s1134_s21, 2048  ;;  %p1136_p5 = scmp.lt.s32.totalorder %s1478_s8, %s1134_s21 }
  0x42   : > { %406 = vmatprep.mubr.f32.mxu0 %v1198_v0  ;;  %312 = vperm.xlu0 %1079, %v293_v16   ;;  %p1132_p4 = pneg %p1131_p13  ;;  %p1137_p7 = scmp.lt.s32.totalorder %s1135_s13, %s1129_s19 }
  0x44   : > { %651 = vperm.xlu1 %1080, %v648_v17   ;;  %v459_v17 = vld [vmem:[#allocation2] sm:$0xff]  ;;  %p1138_p8 = por %p1137_p7, %p1136_p5 }
  0x45   : > { %1007 = vmatmul.mubr.msk.f32.gmra.mxu0 %vm320_vm0, %v286_v15 }
  0x46   : > { %412 = vmatprep.mubr.f32.mxu0 %v1198_v0  ;;  %p1139_p10 = pnand %p1138_p8, %p1132_p4 }
  0x49   : > { %1008 = vmatmul.mubr.msk.f32.gmra.mxu0 %vm320_vm0, %v287_v18  ;;  %v556_v18 = vld [vmem:[#allocation2 + $0x20] sm:$0x1] }
  0x4a   : > { %418 = vmatprep.mubr.f32.mxu0 %v1198_v0 }
  0x4d   : > { %1009 = vmatmul.mubr.msk.f32.gmra.mxu0 %vm320_vm0, %v288_v19 }
  0x4e   : > { %424 = vmatprep.mubr.f32.mxu0 %v1198_v0 }
  0x51   : > { %1010 = vmatmul.mubr.msk.f32.gmra.mxu0 %vm320_vm0, %v289_v20 }
  0x52   : > { %621 = vmatprep.mubr.f32.mxu0 %v1200_v21 }
  0xb5   : > { %v318_v22 = vpop.permute.xlu0 %317 }
  0xb7   : > { %v303_v60 = vpop.permute.xlu1 %302 }
  0xb9   : > { %v298_v24 = vpop.permute.xlu0 %297 }
  0xbb   : > { %v308_v9 = vpop.permute.xlu1 %307 }
  0xbd   : > { %v313_v14 = vpop.permute.xlu0 %312 }
 0x101   : > { %v402_v23 = vpop.f32.mrf.mxu0 }
 0x102   : > { %v403_v62 = vadd.f32 %v402_v23, %v298_v24 }
 0x103   : > { %v404_v25 = vpop.f32.mrf.mxu0 }
 0x104   : > { %v405_v26 = vadd.f32 %v404_v25, %v298_v24  ;;  %v460_v25 = vld [vmem:[#allocation2 + $0x8] sm:$0xff] }
 0x105   : > { %v408_v27 = vpop.f32.mrf.mxu0 }
 0x106   : > { %527 = vmatprep.mubr.f32.mxu1 %v405_v26  ;;  %v409_v1 = vadd.f32 %v408_v27, %v303_v60 }
 0x107   : > { %v410_v28 = vpop.f32.mrf.mxu0 }
 0x108   : > { %v411_v63 = vadd.f32 %v410_v28, %v303_v60 }
 0x109   : > { %v1427_v29 = vpop.f32.mrf.mxu0 }
 0x10a   : > { %v415_v13 = vadd.f32 %v1427_v29, %v308_v9  ;;  %v461_v29 = vld [vmem:[#allocation2 + $0x10] sm:$0xff] }
 0x10b   : > { %v416_v30 = vpop.f32.mrf.mxu0 }
 0x10c   : > { %v417_v11 = vadd.f32 %v416_v30, %v308_v9  ;;  %v652_v30 = vpop.permute.xlu1 %651 }
 0x10d   : > { %v1429_v31 = vpop.f32.mrf.mxu0 }
 0x10e   : > { %v421_v16 = vadd.f32 %v1429_v31, %v313_v14 }
 0x10f   : > { %v1431_v32 = vpop.f32.mrf.mxu0 }
 0x110   : > { %v423_v15 = vadd.f32 %v1431_v32, %v313_v14 }
 0x111   : > { %v426_v33 = vpop.f32.mrf.mxu0 }
 0x112   : > { %v427_v34 = vadd.f32 %v426_v33, %v318_v22 }
 0x113   : > { %v428_v35 = vpop.f32.mrf.mxu0 }
 0x114   : > { %v433_v36 = vmin.f32 %v427_v34, 20.0  ;;  %v429_v37 = vadd.f32 %v428_v35, %v318_v22  ;;  %vm431_vm5 = vcmp.gt.f32.partialorder %v427_v34, 20.0 }
 0x116   : > { %v435_v38 = vmul.f32 1.442695, %v433_v36  ;;  %v434_v39 = vmin.f32 %v429_v37, 20.0  ;;  %vm432_vm4 = vcmp.gt.f32.partialorder %v429_v37, 20.0 }
 0x118   : > { %1081 = vpow2.f32 %v435_v38  ;;  %v437_v40 = vmul.f32 1.442695, %v434_v39  ;;  %v462_v38 = vld [vmem:[#allocation2 + $0x18] sm:$0xff] }
 0x11a   : > { %1083 = vpow2.f32 %v437_v40 }
 0x125   : > { %v1082_v41 = vpop.eup %1081 }
 0x126   : > { %v439_v42 = vadd.f32 1.0, %v1082_v41  ;;  %v442_v45 = vmul.f32 -0.5, %v1082_v41  ;;  %v445_v49 = vand.u32 2147483647, %v1082_v41 }
 0x127   : > { %v1084_v43 = vpop.eup %1083 }
 0x128   : > { %v448_v44 = vadd.f32 1.0, %v1084_v43  ;;  %1085 = vlog2.f32 %v439_v42  ;;  %v451_v46 = vmul.f32 -0.5, %v1084_v43  ;;  %v443_v47 = vadd.f32 1.0, %v442_v45 }
 0x129   : > { %v454_v51 = vand.u32 2147483647, %v1084_v43  ;;  %vm446_vm2 = vcmp.lt.f32.partialorder %v445_v49, 0.0004427343 }
 0x12a   : > { %1087 = vlog2.f32 %v448_v44  ;;  %v452_v48 = vadd.f32 1.0, %v451_v46  ;;  %v444_v54 = vmul.f32 %v1082_v41, %v443_v47 }
 0x12b   : > { %vm455_vm3 = vcmp.lt.f32.partialorder %v454_v51, 0.0004427343 }
 0x12c   : > { %v453_v56 = vmul.f32 %v1084_v43, %v452_v48 }
 0x135   : > { %v1086_v50 = vpop.eup %1085 }
 0x136   : > { %v441_v52 = vmul.f32 0.6931472, %v1086_v50 }
 0x137   : > { %v1088_v53 = vpop.eup %1087 }
 0x138   : > { %v450_v55 = vmul.f32 0.6931472, %v1088_v53  ;;  %v447_v57 = vsel %vm446_vm2, %v444_v54, %v441_v52 }
 0x139   : > { %v457_v61 = vsel %vm431_vm5, %v427_v34, %v447_v57 }
 0x13a   : > { %v456_v58 = vsel %vm455_vm3, %v453_v56, %v450_v55 }
 0x13b   : > { %v458_v59 = vsel %vm432_vm4, %v429_v37, %v456_v58 }
 0x13c   : > { %493 = vmatprep.subr.mxu1 %v458_v59  ;;  %587 = vmatprep.subr.mxu0 %v458_v59 }
 0x13d   : > { %494 = vmatpush1.xpose.msra.mxu1 %v457_v61  ;;  %588 = vmatpush1.xpose.msra.mxu0 %v457_v61 }
 0x13e   : > { %681 = vmatprep.subr.mxu0 %v1350_v2 }
 0x140   : > { %528 = vmatmul.mubr.f32.vlgmr.msra.gmra.mxu1 %v403_v62  ;;  %622 = vmatmul.mubr.f32.vlgmr.msra.gmra.mxu0 %v1200_v21 }
 0x141   : > { %532 = vmatprep.mubr.f32.mxu1 %v411_v63  ;;  %682 = vmatpush1.msra.mxu0 %v1352_v3 }
 0x142   : > { %683 = vmatprep.subr.mxu0 %v1354_v4  ;;  %721 = vmatprep.mubr.f32.mxu0 %v1198_v0 }
 0x143   : > { %684 = vmatpush1.msra.mxu0 %v1357_v5 }
 0x144   : > { %533 = vmatmul.mubr.f32.gmra.mxu1 %v409_v1  ;;  %685 = vmatprep.subr.mxu0 %v1360_v6 }
 0x145   : > { %537 = vmatprep.mubr.f32.mxu1 %v417_v11  ;;  %686 = vmatpush1.msra.mxu0 %v1363_v7 }
 0x146   : > { %687 = vmatprep.subr.mxu0 %v1366_v8 }
 0x147   : > { %688 = vmatpush1.msra.mxu0 %v1372_v10 }
 0x148   : > { %538 = vmatmul.mubr.f32.gmra.mxu1 %v415_v13  ;;  %1011 = vmatmul.mubr.msk.f32.vlgmr.msra.gmra.mxu0 %vm320_vm0, %v647_v12 }
 0x149   : > { %542 = vmatprep.mubr.f32.mxu1 %v423_v15 }
 0x14c   : > { %543 = vmatmul.mubr.f32.gmra.mxu1 %v421_v16 }
 0x14d   : > { %842 = vmatprep.mubr.f32.mxu1 %v1198_v0 }
 0x200   : > { %v529_v19 = vpop.f32.mrf.mxu1  ;;  %v623_v20 = vpop.f32.mrf.mxu0 }
 0x201   : > { %v548_v21 = vadd.f32 %v529_v19, %v459_v17  ;;  %v627_v22 = vadd.f32 %v623_v20, %v556_v18 }
 0x202   : > { %v531_v23 = vpop.f32.mrf.mxu1  ;;  %v625_v24 = vpop.f32.mrf.mxu0 }
 0x203   : > { %552 = vst.msk [vmem:[#allocation2] sm:$0xff] %vm271_vm1, %v548_v21 }
 0x204   : > { %629 = vst.msk [vmem:[#allocation2 + $0x20] sm:$0x1] %vm628_vm6, %v627_v22  ;;  %v534_v26 = vpop.f32.mrf.mxu1 }
 0x205   : > { %v549_v27 = vadd.f32 %v534_v26, %v460_v25 }
 0x206   : > { %v536_v28 = vpop.f32.mrf.mxu1 }
 0x207   : > { %553 = vst.msk [vmem:[#allocation2 + $0x8] sm:$0xff] %vm271_vm1, %v549_v27  ;;  %v878_v28 = vlaneseq }
 0x208   : > { %v539_v31 = vpop.f32.mrf.mxu1  ;;  %v723_v32 = vpop.f32.mrf.mxu0 }
 0x209   : > { %v550_v33 = vadd.f32 %v539_v31, %v461_v29  ;;  %v724_v34 = vadd.f32 %v723_v32, %v652_v30  ;;  %v873_v29 = vstv %s638_s18 }
 0x20a   : > { %v541_v36 = vpop.f32.mrf.mxu1  ;;  %v725_v37 = vpop.f32.mrf.mxu0  ;;  %v633_v13 = vld [vmem:[#allocation2] sm:$0xff] }
 0x20b   : > { %v630_v35 = vld [vmem:[#allocation2 + $0x20] sm:$0x1]  ;;  %554 = vst.msk [vmem:[#allocation2 + $0x10] sm:$0xff] %vm271_vm1, %v550_v33  ;;  %v730_v40 = vmin.f32 %v724_v34, 20.0  ;;  %v726_v41 = vadd.f32 %v725_v37, %v652_v30  ;;  %vm728_vm11 = vcmp.gt.f32.partialorder %v724_v34, 20.0 }
 0x20c   : > { %v631_v39 = vadd.f32 1e-06, %v630_v35  ;;  %v544_v42 = vpop.f32.mrf.mxu1 }
 0x20d   : > { %v732_v43 = vmul.f32 1.442695, %v730_v40  ;;  %v731_v44 = vmin.f32 %v726_v41, 20.0  ;;  %v551_v45 = vadd.f32 %v544_v42, %v462_v38  ;;  %vm729_vm10 = vcmp.gt.f32.partialorder %v726_v41, 20.0 }
 0x20e   : > { %632 = vst.msk [vmem:[#allocation2 + $0x20] sm:$0x1] %vm628_vm6, %v631_v39  ;;  %v546_v46 = vpop.f32.mrf.mxu1  ;;  %v634_v14 = vld [vmem:[#allocation2 + $0x8] sm:$0xff] }
 0x20f   : > { %1089 = vpow2.f32 %v732_v43  ;;  %v734_v47 = vmul.f32 1.442695, %v731_v44  ;;  %555 = vst.msk [vmem:[#allocation2 + $0x18] sm:$0xff] %vm271_vm1, %v551_v45 }
 0x211   : > { %1091 = vpow2.f32 %v734_v47 }
 0x212   : > { %v635_v15 = vld [vmem:[#allocation2 + $0x10] sm:$0xff] }
 0x215   : > { %v637_v17 = vld [vmem:[#allocation2 + $0x20] sm:$0xff] }
 0x216   : > { %v636_v16 = vld [vmem:[#allocation2 + $0x18] sm:$0xff] }
 0x21c   : > { %v1090_v48 = vpop.eup %1089 }
 0x21d   : > { %v736_v49 = vadd.f32 1.0, %v1090_v48  ;;  %v739_v52 = vmul.f32 -0.5, %v1090_v48  ;;  %v742_v55 = vand.u32 2147483647, %v1090_v48 }
 0x21e   : > { %v1092_v50 = vpop.eup %1091 }
 0x21f   : > { %1093 = vlog2.f32 %v736_v49  ;;  %v745_v51 = vadd.f32 1.0, %v1092_v50  ;;  %v748_v53 = vmul.f32 -0.5, %v1092_v50  ;;  %v740_v54 = vadd.f32 1.0, %v739_v52 }
 0x220   : > { %v751_v58 = vand.u32 2147483647, %v1092_v50  ;;  %vm743_vm7 = vcmp.lt.f32.partialorder %v742_v55, 0.0004427343 }
 0x221   : > { %1095 = vlog2.f32 %v745_v51  ;;  %v749_v56 = vadd.f32 1.0, %v748_v53  ;;  %v741_v61 = vmul.f32 %v1090_v48, %v740_v54 }
 0x222   : > { %vm752_vm8 = vcmp.lt.f32.partialorder %v751_v58, 0.0004427343 }
 0x223   : > { %v750_v63 = vmul.f32 %v1092_v50, %v749_v56 }
 0x22c   : > { %v1094_v57 = vpop.eup %1093 }
 0x22d   : > { %v738_v59 = vmul.f32 0.6931472, %v1094_v57 }
 0x22e   : > { %v1096_v60 = vpop.eup %1095 }
 0x22f   : > { %v747_v62 = vmul.f32 0.6931472, %v1096_v60  ;;  %v744_v1 = vsel %vm743_vm7, %v741_v61, %v738_v59 }
 0x230   : > { %v754_v12 = vsel %vm728_vm11, %v724_v34, %v744_v1 }
 0x231   : > { %v753_v9 = vsel %vm752_vm8, %v750_v63, %v747_v62 }
 0x232   : > { %v755_v11 = vsel %vm729_vm10, %v726_v41, %v753_v9 }
 0x233   : > { %1012 = vmatprep.subr.msk.mxu1 %vm771_vm9, %v755_v11 }
 0x234   : > { %1013 = vmatpush1.msk.msra.mxu1 %vm771_vm9, %v754_v12 }
 0x235   : > { %1014 = vmatmul.mubr.msk.f32.vlgmr.msra.gmra.mxu1 %vm271_vm1, %v633_v13 }
 0x236   : > { %848 = vmatprep.mubr.f32.mxu1 %v1198_v0 }
 0x239   : > { %1015 = vmatmul.mubr.msk.f32.gmra.mxu1 %vm271_vm1, %v634_v14 }
 0x23a   : > { %854 = vmatprep.mubr.f32.mxu1 %v1198_v0 }
 0x23d   : > { %1016 = vmatmul.mubr.msk.f32.gmra.mxu1 %vm271_vm1, %v635_v15 }
 0x23e   : > { %860 = vmatprep.mubr.f32.mxu1 %v1198_v0 }
 0x241   : > { %1017 = vmatmul.mubr.msk.f32.gmra.mxu1 %vm271_vm1, %v636_v16 }
 0x242   : > { %866 = vmatprep.mubr.f32.mxu1 %v1198_v0  ;;  %v879_v0 = vshrl.u32 %v878_v28, 7 }
 0x244   : > { %v880_v30 = vsub.s32 0, %v879_v0 }
 0x245   : > { %1018 = vmatmul.mubr.msk.f32.gmra.mxu1 %vm271_vm1, %v637_v17 }
 0x2f5   : > { %v844_v18 = vpop.f32.mrf.mxu1 }
 0x2f7   : > { %v846_v19 = vpop.f32.mrf.mxu1 }
 0x2f9   : > { %v850_v20 = vpop.f32.mrf.mxu1 }
 0x2fb   : > { %v852_v21 = vpop.f32.mrf.mxu1 }
 0x2fd   : > { %v856_v22 = vpop.f32.mrf.mxu1 }
 0x2ff   : > { %v858_v23 = vpop.f32.mrf.mxu1 }
 0x301   : > { %v862_v24 = vpop.f32.mrf.mxu1 }
 0x303   : > { %v864_v25 = vpop.f32.mrf.mxu1 }
 0x305   : > { %v868_v26 = vpop.f32.mrf.mxu1 }
 0x306   : > { %1097 = vrcp.f32 %v868_v26 }
 0x307   : > { %v870_v27 = vpop.f32.mrf.mxu1 }
 0x308   : > { %1099 = vrcp.f32 %v870_v27 }
 0x313   : > { %v1098_v31 = vpop.eup %1097 }
 0x314   : > { %v875_v32 = vmul.f32 %v1098_v31, %v873_v29 }
 0x315   : > { %v1100_v33 = vpop.eup %1099 }
 0x316   : > { %v881_v34 = vrot.slane %v875_v32, %v880_v30  ;;  %v877_v35 = vmul.f32 %v1100_v33, %v873_v29 }
 0x318   : > { %v886_v36 = vmul.f32 %v881_v34, %v844_v18  ;;  %v888_v37 = vmul.f32 %v881_v34, %v850_v20  ;;  %v890_v38 = vmul.f32 %v881_v34, %v856_v22  ;;  %v892_v39 = vmul.f32 %v881_v34, %v862_v24 }
 0x319   : > { %v885_v40 = vrot.slane %v877_v35, %v880_v30 }
 0x31a   : > { %v894_v41 = vadd.f32 %v886_v36, %v1372_v10  ;;  %v896_v42 = vadd.f32 %v888_v37, %v1363_v7  ;;  %v898_v43 = vadd.f32 %v890_v38, %v1357_v5  ;;  %v900_v44 = vadd.f32 %v892_v39, %v1352_v3 }
 0x31b   : > { %v887_v45 = vmul.f32 %v885_v40, %v846_v19  ;;  %v889_v46 = vmul.f32 %v885_v40, %v852_v21  ;;  %v891_v47 = vmul.f32 %v885_v40, %v858_v23  ;;  %v893_v48 = vmul.f32 %v885_v40, %v864_v25 }
 0x31c   : > { %902 = vst [vmem:[%s270_s30] sm:$0xff] %v894_v41  ;;  %904 = vst [vmem:[%s270_s30 + $0x10] sm:$0xff] %v896_v42 }
 0x31d   : > { %906 = vst [vmem:[%s270_s30 + $0x20] sm:$0xff] %v898_v43  ;;  %908 = vst [vmem:[%s270_s30 + $0x30] sm:$0xff] %v900_v44  ;;  %v895_v3 = vadd.f32 %v887_v45, %v1366_v8  ;;  %v897_v5 = vadd.f32 %v889_v46, %v1360_v6  ;;  %v899_v7 = vadd.f32 %v891_v47, %v1354_v4 }
 0x31e   : > { %v901_v10 = vadd.f32 %v893_v48, %v1350_v2 }
 0x31f   : > { %903 = vst [vmem:[%s270_s30 + $0x8] sm:$0xff] %v895_v3  ;;  %905 = vst [vmem:[%s270_s30 + $0x18] sm:$0xff] %v897_v5 }
 0x320   : > { %907 = vst [vmem:[%s270_s30 + $0x28] sm:$0xff] %v899_v7  ;;  %909 = vst [vmem:[%s270_s30 + $0x38] sm:$0xff] %v901_v10 }
 0x321   : > { %1142 = shalt.err (!%p1139_p10)
}
 0x322   : > { %s1143_s12 = scalar_lea.hbm %s1476_s9, 1024  ;;  %s1147_s16 = scalar_lea.hbm %s1531_s6, 2048 }
 0x323   : > { %p1144_p0 = scmp.ne.s32.totalorder %s1476_s9, %s1143_s12  ;;  %p1148_p1 = scmp.lt.s32.totalorder %s1476_s9, %s1531_s6 }
 0x324   : > { %p1149_p3 = scmp.lt.s32.totalorder %s1147_s16, %s1143_s12 }
 0x325   : > { %p1145_p2 = pnand %p1144_p0, %p1540_p12 }
 0x326   : > { %p1150_p6 = por %p1149_p3, %p1148_p1 }
 0x327   : > { %p1146_p9 = pneg %p1145_p2 }
 0x329   : > { %p1151_p11 = pnand %p1150_p6, %p1146_p9 }
 0x32b   : > { %1154 = shalt.err (!%p1151_p11)
}
 0x32c   : > { %s1202_s30 = smov 256   ;;  %s1203_s5 = smov 16  }
 0x32d   : > { %1028 = dma.vmem_to_hbm [thread:$0]  (%p1540_p12), %s1478_s8, 1024, %s1476_s9, %s911_s17, %s1202_s30, %s1202_s30, %s1203_s5  }
 0x32e PF: > { %s939_s29 = sand.u32 1, %s1181_s23   ;;  %p1541_p13 = scmp.ne.s32.totalorder %s1537_s11, 0 }
 0x32f   : > { %p1542_p4 = scmp.ge.s32.totalorder %s1193_s26, 2  ;;  %s940_s19 = scalar_lea.sflag [#allocation6], %s939_s29 }
 0x331   : > { %p1035_p5 = pnand %p1542_p4, %p1541_p13 }
 0x333   : > { %p1036_p7 = pneg %p1035_p5 }
 0x335   : > { %1176 = dma.done.wait (%p1036_p7), %s940_s19, 1024  }
 0x336   : > { %1178 = vsyncadd (%p1036_p7), %s940_s19, 4294966272  ;;  %p20_p8 = scmp.ge.s32.totalorder %s1267_s28, 4   ;;  %s1543_s23 = smov %s1185_s24 }
 0x337   : > { %s1544_s24 = smov %s1189_s25  ;;  %s1545_s25 = smov %s1279_s7 }
 0x338   : > { %s1546_s26 = smov %s1267_s28  ;;  %22 = sbr.rel (!%p20_p8) target bundleno = 7 (0x7), region = 89 }
 0x33d   :  { %945 = vsyncpa [#allocation5], 1 }
 0x33e   :  { %947 = vsyncpa [#allocation5 + $0x1], 1 }
 0x33f   :  { %948 = vsyncpa [#allocation6], 1 }
 0x340   :  { %950 = vsyncpa [#allocation6 + $0x1], 1 }

</bundles_post_ra>
